<compile_context>
chip_gen: v6e
topology: v6e:2x2x1
jax: 0.10.0
libtpu: 0.0.40
codegen_flags: <defaults>
</compile_context>

<pallas_src>
import jax
import jax.numpy as jnp
from jax import lax
from jax.experimental import pallas as pl
from jax.experimental.pallas import tpu as pltpu


def _mlp_kernel(x_ref, w1_ref, b1_ref, w2_ref, b2_ref, w3_ref, b3_ref, o_ref):
    # layer1: W1 (H, D) contracted with x (block_b, D) along D -> (H, block_b).
    # x arrives as raw f32 HBM tiles; cast + relayout happen here in VMEM.
    x_bf = x_ref[...].astype(jnp.bfloat16)
    h1 = lax.dot_general(
        w1_ref[...], x_bf,
        dimension_numbers=(((1,), (1,)), ((), ())),
        preferred_element_type=jnp.float32)                       # (H, block_b) f32
    # bias + ReLU in f32, materialize bf16 (layer-2 MXU input anyway).
    h1 = jnp.maximum(h1 + b1_ref[...], 0.0).astype(jnp.bfloat16)
    # layer2: (H, H) @ (H, block_b) -> (H, block_b), bf16 MXU, f32 accumulate.
    h2 = jnp.dot(w2_ref[...], h1, preferred_element_type=jnp.float32)
    h2 = jnp.maximum(h2 + b2_ref[...], 0.0)
    # layer3 (N=1): VPU multiply + sublane reduce -> lane-dense (1, block_b).
    logits = jnp.sum(h2 * w3_ref[...], axis=0, keepdims=True) + b3_ref[0]
    o_ref[...] = jax.nn.sigmoid(logits).astype(o_ref.dtype)


def _round_up(x, m):
    return ((x + m - 1) // m) * m


# Per-step footprint at 8192 lanes ~= 6 MiB -> fits scoped-VMEM defaults on
# v5e/v6e (16/32 MiB) and v7x (32 MiB scoped / 64 MiB physical).
_MAX_BLOCK = 8192


def _choose_block_b(batch):
    # Small / mid batches: one grid step.  block == full array, so there are no
    # (8,128) alignment constraints and zero per-step overhead -- best on the
    # single-TensorCore chips (v5e/v6e) and negligible loss on v7x at this size.
    if batch <= 1024:
        return batch
    # Large batches: an even number of steps (>=2) so dimension_semantics=
    # ("parallel",) shards the batch across v7x's two TensorCores; blocks are a
    # multiple of 256 lanes and capped at _MAX_BLOCK so the per-step footprint
    # stays comfortably inside scoped VMEM on every generation.
    steps = 2
    while _round_up(pl.cdiv(batch, steps), 256) > _MAX_BLOCK:
        steps += 2
    return _round_up(pl.cdiv(batch, steps), 256)


@jax.jit
def classifier_forward(x, w1, b1, w2, b2, w3, b3):
    """x: (B, D) f32.  Weights in PyTorch layout: w1 (H, D), w2 (H, H), w3 (1, H)."""
    B, D = x.shape
    H = w1.shape[0]

    block_b = _choose_block_b(B)
    num_blocks = pl.cdiv(B, block_b)

    # Tiny weight/bias prep only (a few KiB); x itself goes to the kernel untouched.
    w1b = w1.astype(jnp.bfloat16)                    # (H, D)  MXU operand
    w2b = w2.astype(jnp.bfloat16)                    # (H, H)  MXU operand
    b1c = b1.reshape(H, 1).astype(jnp.float32)
    b2c = b2.reshape(H, 1).astype(jnp.float32)
    w3c = w3.reshape(H, 1).astype(jnp.float32)       # layer3 runs on the VPU
    b3c = b3.reshape(1).astype(jnp.float32)          # SMEM scalar

    out_row = pl.pallas_call(
        _mlp_kernel,
        out_shape=jax.ShapeDtypeStruct((1, B), jnp.float32),
        grid_spec=pltpu.PrefetchScalarGridSpec(
            num_scalar_prefetch=0,
            grid=(num_blocks,),
            in_specs=[
                # x: tiled over batch (sublane axis of the load, lane axis after
                # the in-kernel relayout); D=32 is the full last dim -> legal block.
                pl.BlockSpec((block_b, D), lambda i: (i, 0)),
                # weights / biases: constant index_map -> VMEM resident across steps
                pl.BlockSpec((H, D), lambda i: (0, 0)),
                pl.BlockSpec((H, 1), lambda i: (0, 0)),
                pl.BlockSpec((H, H), lambda i: (0, 0)),
                pl.BlockSpec((H, 1), lambda i: (0, 0)),
                pl.BlockSpec((H, 1), lambda i: (0, 0)),
                # b3: scalar via SMEM (cheaper than a (1,1) VMEM tile at small B)
                pl.BlockSpec(memory_space=pltpu.MemorySpace.SMEM),
            ],
            out_specs=pl.BlockSpec((1, block_b), lambda i: (0, i)),
        ),
        compiler_params=pltpu.CompilerParams(
            dimension_semantics=("parallel",)),
    )(x, w1b, b1c, w2b, b2c, w3c, b3c)

    # (1, B) lane-dense row -> (B, 1) torch-style output (pure metadata reshape).
    return out_row.reshape(B, 1)


def init_params(key, input_size, hidden=64, out=1):
    # Deterministic init mimicking torch's uniform(-1/sqrt(fan_in), 1/sqrt(fan_in)),
    # weights stored in PyTorch (out_features, in_features) layout.
    ks = jax.random.split(key, 6)

    def lin(kw, kb, fan_in, fan_out):
        bound = float(fan_in) ** -0.5
        w = jax.random.uniform(kw, (fan_out, fan_in), jnp.float32, -bound, bound)
        b = jax.random.uniform(kb, (fan_out,), jnp.float32, -bound, bound)
        return w, b

    w1, b1 = lin(ks[0], ks[1], input_size, hidden)
    w2, b2 = lin(ks[2], ks[3], hidden, hidden)
    w3, b3 = lin(ks[4], ks[5], hidden, out)
    return w1, b1, w2, b2, w3, b3


if __name__ == "__main__":
    key = jax.random.PRNGKey(0)
    kx, kp = jax.random.split(key)

    batch, input_size = 16, 32
    x = jax.random.normal(kx, (batch, input_size), dtype=jnp.float32)
    params = init_params(kp, input_size)

    out = jax.block_until_ready(classifier_forward(x, *params))

    # Pure-JAX f32 reference (torch semantics: x @ W.T + b)
    w1, b1, w2, b2, w3, b3 = params
    h = jnp.maximum(x @ w1.T + b1, 0.0)
    h = jnp.maximum(h @ w2.T + b2, 0.0)
    ref = jax.nn.sigmoid(h @ w3.T + b3)

    assert out.shape == (batch, 1)
    # bf16 MXU operands with f32 accumulation -> small deviation from f32 ref.
    assert jnp.allclose(out, ref, atol=2e-2), float(jnp.max(jnp.abs(out - ref)))

    print("KERNEL_OK")
</pallas_src>

<mosaic_0001>
module attributes {stable_mosaic.version = 11 : i64} {
  func.func @_mlp_kernel(%arg0: i32, %arg1: memref<16x32xf32, #tpu.memory_space<vmem>>, %arg2: memref<64x32xbf16, #tpu.memory_space<vmem>>, %arg3: memref<64x1xf32, #tpu.memory_space<vmem>>, %arg4: memref<64x64xbf16, #tpu.memory_space<vmem>>, %arg5: memref<64x1xf32, #tpu.memory_space<vmem>>, %arg6: memref<64x1xf32, #tpu.memory_space<vmem>>, %arg7: memref<1xf32, #tpu.memory_space<smem>>, %arg8: memref<1x16xf32, #tpu.memory_space<vmem>>) attributes {dimension_semantics = [#tpu.dimension_semantics<parallel>], iteration_bounds = array<i64: 1>, scalar_prefetch = 0 : i64, scratch_operands = 0 : i64, tpu.core_type = #tpu.core_type<tc>, window_params = [{transform_indices = @transform_0, window_bounds = array<i64: 16, 32>}, {pipeline_mode = #tpu.pipeline_mode<synchronous>, transform_indices = @transform_1, window_bounds = array<i64: 64, 32>}, {pipeline_mode = #tpu.pipeline_mode<synchronous>, transform_indices = @transform_2, window_bounds = array<i64: 64, 1>}, {pipeline_mode = #tpu.pipeline_mode<synchronous>, transform_indices = @transform_3, window_bounds = array<i64: 64, 64>}, {pipeline_mode = #tpu.pipeline_mode<synchronous>, transform_indices = @transform_4, window_bounds = array<i64: 64, 1>}, {pipeline_mode = #tpu.pipeline_mode<synchronous>, transform_indices = @transform_5, window_bounds = array<i64: 64, 1>}, {transform_indices = @transform_6, window_bounds = array<i64: 1>}, {transform_indices = @transform_7, window_bounds = array<i64: 1, 16>}]} {
    %c0 = arith.constant 0 : index
    %c0_0 = arith.constant 0 : index
    %0 = vector.load %arg1[%c0, %c0_0] : memref<16x32xf32, #tpu.memory_space<vmem>>, vector<16x32xf32>
    %1 = arith.truncf %0 : vector<16x32xf32> to vector<16x32xbf16>
    %c0_1 = arith.constant 0 : index
    %c0_2 = arith.constant 0 : index
    %2 = vector.load %arg2[%c0_1, %c0_2] : memref<64x32xbf16, #tpu.memory_space<vmem>>, vector<64x32xbf16>
    %cst = arith.constant dense<0.000000e+00> : vector<64x16xf32>
    %3 = tpu.matmul %2, %1, %cst {dimension_numbers = #tpu.dot_dimension_numbers<[1], [1], [0], [0], [0, 0, 1, 0], [], []>} : vector<64x32xbf16>, vector<16x32xbf16>, vector<64x16xf32> -> vector<64x16xf32>
    %c0_3 = arith.constant 0 : index
    %c0_4 = arith.constant 0 : index
    %4 = vector.load %arg3[%c0_3, %c0_4] : memref<64x1xf32, #tpu.memory_space<vmem>>, vector<64x1xf32>
    %5 = vector.broadcast %4 : vector<64x1xf32> to vector<64x16xf32>
    %6 = arith.addf %3, %5 : vector<64x16xf32>
    %cst_5 = arith.constant 0.000000e+00 : f32
    %7 = vector.broadcast %cst_5 : f32 to vector<64x16xf32>
    %8 = arith.maximumf %6, %7 : vector<64x16xf32>
    %9 = arith.truncf %8 : vector<64x16xf32> to vector<64x16xbf16>
    %c0_6 = arith.constant 0 : index
    %c0_7 = arith.constant 0 : index
    %10 = vector.load %arg4[%c0_6, %c0_7] : memref<64x64xbf16, #tpu.memory_space<vmem>>, vector<64x64xbf16>
    %cst_8 = arith.constant dense<0.000000e+00> : vector<64x16xf32>
    %11 = tpu.matmul %10, %9, %cst_8 {dimension_numbers = #tpu.dot_dimension_numbers<[1], [0], [0], [1], [0, 0, 1, 1], [], []>} : vector<64x64xbf16>, vector<64x16xbf16>, vector<64x16xf32> -> vector<64x16xf32>
    %c0_9 = arith.constant 0 : index
    %c0_10 = arith.constant 0 : index
    %12 = vector.load %arg5[%c0_9, %c0_10] : memref<64x1xf32, #tpu.memory_space<vmem>>, vector<64x1xf32>
    %13 = vector.broadcast %12 : vector<64x1xf32> to vector<64x16xf32>
    %14 = arith.addf %11, %13 : vector<64x16xf32>
    %cst_11 = arith.constant 0.000000e+00 : f32
    %15 = vector.broadcast %cst_11 : f32 to vector<64x16xf32>
    %16 = arith.maximumf %14, %15 : vector<64x16xf32>
    %c0_12 = arith.constant 0 : index
    %c0_13 = arith.constant 0 : index
    %17 = vector.load %arg6[%c0_12, %c0_13] : memref<64x1xf32, #tpu.memory_space<vmem>>, vector<64x1xf32>
    %18 = vector.broadcast %17 : vector<64x1xf32> to vector<64x16xf32>
    %19 = arith.mulf %16, %18 : vector<64x16xf32>
    %cst_14 = arith.constant dense<0.000000e+00> : vector<16xf32>
    %20 = vector.multi_reduction <add>, %19, %cst_14 [0] : vector<64x16xf32> to vector<16xf32>
    %21 = vector.shape_cast %20 : vector<16xf32> to vector<1x16xf32>
    %c0_15 = arith.constant 0 : index
    %22 = memref.load %arg7[%c0_15] : memref<1xf32, #tpu.memory_space<smem>>
    %23 = vector.broadcast %22 : f32 to vector<1x16xf32>
    %24 = arith.addf %21, %23 : vector<1x16xf32>
    %25 = arith.negf %24 : vector<1x16xf32>
    %26 = math.exp %25 : vector<1x16xf32>
    %cst_16 = arith.constant 1.000000e+00 : f32
    %27 = vector.broadcast %cst_16 : f32 to vector<1x16xf32>
    %28 = arith.addf %27, %26 : vector<1x16xf32>
    %29 = arith.divf %27, %28 : vector<1x16xf32>
    %c0_17 = arith.constant 0 : index
    %c0_18 = arith.constant 0 : index
    %30 = vector.load %arg8[%c0_17, %c0_18] : memref<1x16xf32, #tpu.memory_space<vmem>>, vector<1x16xf32>
    tpu.vector_store %arg8[%c0_17, %c0_18], %29 {strides = array<i32>} : memref<1x16xf32, #tpu.memory_space<vmem>>, vector<1x16xf32>,
    return
  }
  func.func @transform_0(%arg0: i32) -> (i32, i32) {
    %c0_i32 = arith.constant 0 : i32
    %c0_i32_0 = arith.constant 0 : i32
    return %arg0, %c0_i32 : i32, i32
  }
  func.func @transform_1(%arg0: i32) -> (i32, i32) {
    %c0_i32 = arith.constant 0 : i32
    %c0_i32_0 = arith.constant 0 : i32
    %c0_i32_1 = arith.constant 0 : i32
    return %c0_i32, %c0_i32_0 : i32, i32
  }
  func.func @transform_2(%arg0: i32) -> (i32, i32) {
    %c0_i32 = arith.constant 0 : i32
    %c0_i32_0 = arith.constant 0 : i32
    %c0_i32_1 = arith.constant 0 : i32
    return %c0_i32, %c0_i32_0 : i32, i32
  }
  func.func @transform_3(%arg0: i32) -> (i32, i32) {
    %c0_i32 = arith.constant 0 : i32
    %c0_i32_0 = arith.constant 0 : i32
    %c0_i32_1 = arith.constant 0 : i32
    return %c0_i32, %c0_i32_0 : i32, i32
  }
  func.func @transform_4(%arg0: i32) -> (i32, i32) {
    %c0_i32 = arith.constant 0 : i32
    %c0_i32_0 = arith.constant 0 : i32
    %c0_i32_1 = arith.constant 0 : i32
    return %c0_i32, %c0_i32_0 : i32, i32
  }
  func.func @transform_5(%arg0: i32) -> (i32, i32) {
    %c0_i32 = arith.constant 0 : i32
    %c0_i32_0 = arith.constant 0 : i32
    %c0_i32_1 = arith.constant 0 : i32
    return %c0_i32, %c0_i32_0 : i32, i32
  }
  func.func @transform_6(%arg0: i32) -> i32 {
    %c0_i32 = arith.constant 0 : i32
    %c0_i32_0 = arith.constant 0 : i32
    return %c0_i32 : i32
  }
  func.func @transform_7(%arg0: i32) -> (i32, i32) {
    %c0_i32 = arith.constant 0 : i32
    %c0_i32_0 = arith.constant 0 : i32
    return %c0_i32, %arg0 : i32, i32
  }
}

</mosaic_0001>

<bundles_post_ra>
// kernel: classifier_forward.1
= control target key start
LH: loop header
LB: loop body
LE: loop exit
PB: predicated region body
PF: predicated region fallthrough
CT: control target
= control target key end

     0   :  { %vm108_vm0 = vcmask 261120   ;;  %v561_v4 = vmov 0   ;;  %s729_s0 = inlined_call_operand.vmem [shape: f32[16,32], index: 0, kind: input, shape index: {}]   ;;  %s730_s1 = inlined_call_operand.vmem [shape: bf16[64,32], index: 1, kind: input, shape index: {}]   ;;  %s731_s2 = inlined_call_operand.vmem [shape: f32[64,1], index: 2, kind: input, shape index: {}]   ;;  %s732_s3 = inlined_call_operand.vmem [shape: bf16[64,64], index: 3, kind: input, shape index: {}]   ;;  %s733_s4 = inlined_call_operand.vmem [shape: f32[64,1], index: 4, kind: input, shape index: {}]   ;;  %s734_s5 = inlined_call_operand.vmem [shape: f32[64,1], index: 5, kind: input, shape index: {}]   ;;  %s735_s6 = inlined_call_operand.<no memory space> [shape: f32[1], index: 6, kind: input, shape index: {}]   ;;  %s736_s7 = inlined_call_operand.hbm [shape: f32[1,16], index: 7, kind: output, shape index: {}]  }
   0x1   :  { %v29_v0 = vld [vmem:[%s729_s0] sm:$0xff]  ;;  %v30_v1 = vld [vmem:[%s729_s0 + $0x8] sm:$0xff]  ;;  %525 = vset.pattern.permute.xlu0 %v561_v4  ;;  %526 = vset.pattern.permute.xlu1 %v561_v4  ;;  %v46_v6 = vld [vmem:[%s731_s2 + $0x30] sm:$0xff] }
   0x2   :  { %v31_v2 = vpack.c.bf16 %v30_v1, %v29_v0  ;;  %v527_v3 = vld [vmem:[%s730_s1] sm:$0xff]   ;;  %80 = vperm.xlu0 %525, %v46_v6   ;;  %v47_v8 = vld [vmem:[%s731_s2 + $0x38] sm:$0xff]  ;;  %v528_v9 = vld [vmem:[%s730_s1 + $0x8] sm:$0xff]  }
   0x3   :  { %498 = vmatprep.mubr.msk.bf16.mxu0 %vm108_vm0, %v527_v3  ;;  %v44_v7 = vld [vmem:[%s731_s2 + $0x20] sm:$0xff]  ;;  %v45_v10 = vld [vmem:[%s731_s2 + $0x28] sm:$0xff]  ;;  %v529_v11 = vld [vmem:[%s730_s1 + $0x10] sm:$0xff]  }
   0x4   :  { %522 = vmatprep.subr.msk.bf16.mxu0 %vm108_vm0, %v31_v2  ;;  %v122_v5 = vsel %vm108_vm0, %v31_v2, 0  ;;  %70 = vperm.xlu1 %526, %v44_v7   ;;  %v42_v12 = vld [vmem:[%s731_s2 + $0x10] sm:$0xff]  ;;  %v43_v13 = vld [vmem:[%s731_s2 + $0x18] sm:$0xff]  ;;  %v40_v14 = vld [vmem:[%s731_s2] sm:$0xff] }
   0x5   :  { %497 = vmatpush3.bf16.xpose.msra.mxu0 %v122_v5  ;;  %v530_v15 = vld [vmem:[%s730_s1 + $0x18] sm:$0xff]   ;;  %v41_v16 = vld [vmem:[%s731_s2 + $0x8] sm:$0xff] }
   0x6   :  { %85 = vperm.xlu0 %525, %v47_v8  }
   0x8   :  { %75 = vperm.xlu1 %526, %v45_v10  }
   0xa   :  { %60 = vperm.xlu0 %525, %v42_v12  }
   0xc   :  { %499 = vmatmul.mubr.msk.bf16.vlgmr.msra.gmra.mxu0 %vm108_vm0, %v528_v9  ;;  %65 = vperm.xlu1 %526, %v43_v13  }
   0xd   :  { %502 = vmatprep.mubr.msk.bf16.mxu0 %vm108_vm0, %v529_v11 }
   0xe   :  { %13 = vsyncpa [#allocation4], 0  ;;  %50 = vperm.xlu0 %525, %v40_v14   ;;  %v209_v17 = vld [vmem:[%s733_s4] sm:$0xff]  ;;  %v210_v18 = vld [vmem:[%s733_s4 + $0x8] sm:$0xff]  ;;  %vm277_vm1 = vcmask 523264   ;;  %vm419_vm2 = vcmask 130048  }
   0xf   :  { %v211_v19 = vld [vmem:[%s733_s4 + $0x10] sm:$0xff]  ;;  %v212_v20 = vld [vmem:[%s733_s4 + $0x18] sm:$0xff]  ;;  %v363_v21 = vld [vmem:[%s734_s5] sm:$0xff]  ;;  %s562_s15 = smov [#allocation3]   ;;  %vm450_vm3 = vcmask 122880  }
  0x10   :  { %55 = vperm.xlu1 %526, %v41_v16   ;;  %v364_v22 = vld [vmem:[%s734_s5 + $0x8] sm:$0xff]  ;;  %v213_v23 = vld [vmem:[%s733_s4 + $0x20] sm:$0xff]  ;;  %v365_v24 = vld [vmem:[%s734_s5 + $0x10] sm:$0xff]  ;;  %s458_s16 = sshll.u32 %s562_s15, 4  ;;  %s459_s16 = int_to_ptr.vmem [resolvable:$true] %s458_s16 }
  0x11   :  { %v214_v25 = vld [vmem:[%s733_s4 + $0x28] sm:$0xff]  ;;  %v366_v26 = vld [vmem:[%s734_s5 + $0x18] sm:$0xff]  ;;  %v215_v27 = vld [vmem:[%s733_s4 + $0x30] sm:$0xff]  ;;  %s539_s17 = scalar_lea.vmem %s459_s16, 16  ;;  %s543_s18 = scalar_lea.vmem %s459_s16, 32 }
  0x12   :  { %219 = vperm.xlu0 %525, %v209_v17   ;;  %v367_v28 = vld [vmem:[%s734_s5 + $0x20] sm:$0xff]  ;;  %v216_v29 = vld [vmem:[%s733_s4 + $0x38] sm:$0xff]  ;;  %v368_v30 = vld [vmem:[%s734_s5 + $0x28] sm:$0xff]  ;;  %p540_p0 = scmp.ne.s32.totalorder %s459_s16, %s539_s17  ;;  %p544_p1 = scmp.lt.s32.totalorder %s459_s16, %s459_s16 }
  0x13   :  { %v369_v31 = vld [vmem:[%s734_s5 + $0x30] sm:$0xff]  ;;  %v370_v32 = vld [vmem:[%s734_s5 + $0x38] sm:$0xff]  ;;  %v531_v33 = vld [vmem:[%s732_s3] sm:$0xff]   ;;  %p545_p2 = scmp.lt.s32.totalorder %s543_s18, %s539_s17 }
  0x14   :  { %503 = vmatmul.mubr.msk.bf16.gmra.mxu0 %vm108_vm0, %v530_v15  ;;  %224 = vperm.xlu1 %526, %v210_v18   ;;  %v532_v6 = vld [vmem:[%s732_s3 + $0x8] sm:$0xff]   ;;  %v533_v7 = vld [vmem:[%s732_s3 + $0x10] sm:$0xff]   ;;  %v534_v8 = vld [vmem:[%s732_s3 + $0x18] sm:$0xff]  }
  0x15   :  { %514 = vmatprep.mubr.msk.bf16.mxu1 %vm277_vm1, %v531_v33  ;;  %p546_p3 = por %p545_p2, %p544_p1 }
  0x16   :  { %229 = vperm.xlu0 %525, %v211_v19  }
  0x17   :  { %p547_p4 = pnand %p546_p3, %p540_p0 }
  0x18   :  { %234 = vperm.xlu1 %526, %v212_v20  }
  0x1a   :  { %373 = vperm.xlu0 %525, %v363_v21  }
  0x1c   :  { %378 = vperm.xlu1 %526, %v364_v22  }
  0x1e   :  { %239 = vperm.xlu0 %525, %v213_v23  }
  0x20   :  { %383 = vperm.xlu1 %526, %v365_v24  }
  0x22   :  { %244 = vperm.xlu0 %525, %v214_v25  }
  0x24   :  { %388 = vperm.xlu1 %526, %v366_v26  }
  0x26   :  { %249 = vperm.xlu0 %525, %v215_v27  }
  0x28   :  { %393 = vperm.xlu1 %526, %v367_v28  }
  0x2a   :  { %254 = vperm.xlu0 %525, %v216_v29  }
  0x2c   :  { %398 = vperm.xlu1 %526, %v368_v30  }
  0x2e   :  { %403 = vperm.xlu0 %525, %v369_v31  }
  0x30   :  { %408 = vperm.xlu1 %526, %v370_v32  }
  0x7d   :  { %v81_v36 = vpop.permute.xlu0 %80 }
  0x7f   :  { %v71_v34 = vpop.permute.xlu1 %70 }
  0x81   :  { %v86_v41 = vpop.permute.xlu0 %85 }
  0x83   :  { %v76_v39 = vpop.permute.xlu1 %75 }
  0x85   :  { %v61_v49 = vpop.permute.xlu0 %60 }
  0x87   :  { %v66_v45 = vpop.permute.xlu1 %65 }
  0x89   :  { %v51_v63 = vpop.permute.xlu0 %50 }
  0x8b   :  { %v56_v59 = vpop.permute.xlu1 %55 }
  0x8d   :  { %v220_v9 = vpop.permute.xlu0 %219 }
  0x8f   :  { %v225_v10 = vpop.permute.xlu1 %224 }
  0x91   :  { %v230_v11 = vpop.permute.xlu0 %229 }
  0x93   :  { %v235_v12 = vpop.permute.xlu1 %234 }
  0x95   :  { %v374_v13 = vpop.permute.xlu0 %373 }
  0x97   :  { %v379_v14 = vpop.permute.xlu1 %378 }
  0x99   :  { %v240_v15 = vpop.permute.xlu0 %239 }
  0x9b   :  { %v384_v16 = vpop.permute.xlu1 %383 }
  0x9d   :  { %v245_v17 = vpop.permute.xlu0 %244 }
  0x9f   :  { %v389_v19 = vpop.permute.xlu1 %388 }
  0xa1   :  { %v250_v26 = vpop.permute.xlu0 %249 }
  0xa3   :  { %v394_v30 = vpop.permute.xlu1 %393 }
  0xcc   :  { %v500_v35 = vpop.f32.mrf.mxu0 }
  0xcd   :  { %v167_v55 = vadd.f32 %v500_v35, %v61_v49 }
  0xce   :  { %v158_v37 = vpop.f32.mrf.mxu0 }
  0xcf   :  { %v191_v0 = vmax.f32 %v167_v55, 0.0  ;;  %v159_v1 = vadd.f32 %v158_v37, %v51_v63 }
  0xd0   :  { %v501_v38 = vpop.f32.mrf.mxu0 }
  0xd1   :  { %v170_v51 = vadd.f32 %v501_v38, %v66_v45  ;;  %v189_v4 = vmax.f32 %v159_v1, 0.0 }
  0xd2   :  { %v161_v40 = vpop.f32.mrf.mxu0 }
  0xd3   :  { %v192_v60 = vmax.f32 %v170_v51, 0.0  ;;  %v162_v61 = vadd.f32 %v161_v40, %v56_v59  ;;  %v255_v40 = vpop.permute.xlu0 %254 }
  0xd4   :  { %v504_v42 = vpop.f32.mrf.mxu0 }
  0xd5   :  { %v183_v44 = vadd.f32 %v504_v42, %v81_v36  ;;  %v198_v2 = vpack.c.bf16 %v192_v60, %v191_v0  ;;  %v190_v3 = vmax.f32 %v162_v61, 0.0 }
  0xd6   :  { %v174_v43 = vpop.f32.mrf.mxu0 }
  0xd7   :  { %v175_v47 = vadd.f32 %v174_v43, %v71_v34  ;;  %v195_v52 = vmax.f32 %v183_v44, 0.0  ;;  %v197_v5 = vpack.c.bf16 %v190_v3, %v189_v4 }
  0xd8   :  { %v505_v46 = vpop.f32.mrf.mxu0 }
  0xd9   :  { %v186_v48 = vadd.f32 %v505_v46, %v86_v41  ;;  %v193_v56 = vmax.f32 %v175_v47, 0.0  ;;  %v399_v47 = vpop.permute.xlu1 %398 }
  0xda   :  { %v177_v50 = vpop.f32.mrf.mxu0 }
  0xdb   :  { %v196_v53 = vmax.f32 %v186_v48, 0.0  ;;  %v178_v54 = vadd.f32 %v177_v50, %v76_v39 }
  0xdd   :  { %v194_v57 = vmax.f32 %v178_v54, 0.0  ;;  %v200_v58 = vpack.c.bf16 %v196_v53, %v195_v52  ;;  %v409_v63 = vpop.permute.xlu1 %408 }
  0xdf   :  { %v199_v62 = vpack.c.bf16 %v194_v57, %v193_v56  ;;  %506 = vmatprep.subr.bf16.mxu1 %v200_v58 }
  0xe0   :  { %507 = vmatpush3.bf16.msra.mxu1 %v200_v58  ;;  %v404_v58 = vpop.permute.xlu0 %403 }
  0xe1   :  { %508 = vmatprep.subr.bf16.mxu1 %v199_v62 }
  0xe4   :  { %509 = vmatpush3.bf16.msra.mxu1 %v199_v62 }
  0xe5   :  { %510 = vmatprep.subr.bf16.mxu1 %v198_v2 }
  0xe8   :  { %511 = vmatpush3.bf16.msra.mxu1 %v198_v2 }
  0xe9   :  { %512 = vmatprep.subr.bf16.mxu1 %v197_v5 }
  0xec   :  { %513 = vmatpush3.bf16.msra.mxu1 %v197_v5 }
  0xef   :  { %515 = vmatmul.mubr.msk.bf16.vlgmr.msra.gmra.mxu1 %vm277_vm1, %v532_v6 }
  0xf0   :  { %518 = vmatprep.mubr.msk.bf16.mxu1 %vm277_vm1, %v533_v7 }
  0xf7   :  { %519 = vmatmul.mubr.msk.bf16.gmra.mxu1 %vm277_vm1, %v534_v8 }
 0x1af   :  { %v516_v18 = vpop.f32.mrf.mxu1 }
 0x1b0   :  { %v333_v21 = vadd.f32 %v516_v18, %v230_v11 }
 0x1b1   :  { %v324_v20 = vpop.f32.mrf.mxu1 }
 0x1b2   :  { %v325_v22 = vadd.f32 %v324_v20, %v220_v9  ;;  %v357_v28 = vmax.f32 %v333_v21, 0.0 }
 0x1b3   :  { %v517_v23 = vpop.f32.mrf.mxu1 }
 0x1b4   :  { %v355_v24 = vmax.f32 %v325_v22, 0.0  ;;  %v336_v25 = vadd.f32 %v517_v23, %v235_v12  ;;  %v413_v36 = vmul.f32 %v384_v16, %v357_v28 }
 0x1b5   :  { %v327_v27 = vpop.f32.mrf.mxu1 }
 0x1b6   :  { %v328_v29 = vadd.f32 %v327_v27, %v225_v10  ;;  %v411_v31 = vmul.f32 %v374_v13, %v355_v24  ;;  %v358_v33 = vmax.f32 %v336_v25, 0.0  ;;  %v423_v50 = vsel %vm419_vm2, %v413_v36, 0.0 }
 0x1b7   :  { %v520_v32 = vpop.f32.mrf.mxu1  ;;  %v442_v13 = vstv %s735_s6 }
 0x1b8   :  { %v356_v34 = vmax.f32 %v328_v29, 0.0  ;;  %v349_v38 = vadd.f32 %v520_v32, %v250_v26  ;;  %v420_v41 = vsel %vm419_vm2, %v411_v31, 0.0  ;;  %v414_v43 = vmul.f32 %v389_v19, %v358_v33 }
 0x1b9   :  { %v340_v35 = vpop.f32.mrf.mxu1 }
 0x1ba   :  { %v412_v37 = vmul.f32 %v379_v14, %v356_v34  ;;  %v341_v39 = vadd.f32 %v340_v35, %v240_v15  ;;  %v361_v51 = vmax.f32 %v349_v38, 0.0  ;;  %v425_v55 = vsel %vm419_vm2, %v414_v43, 0.0 }
 0x1bb   :  { %v521_v42 = vpop.f32.mrf.mxu1 }
 0x1bc   :  { %v421_v44 = vsel %vm419_vm2, %v412_v37, 0.0  ;;  %v359_v45 = vmax.f32 %v341_v39, 0.0  ;;  %v352_v46 = vadd.f32 %v521_v42, %v255_v40  ;;  %v417_v60 = vmul.f32 %v404_v58, %v361_v51 }
 0x1bd   :  { %v422_v48 = vadd.f32 %v421_v44, %v420_v41  ;;  %v343_v49 = vpop.f32.mrf.mxu1 }
 0x1be   :  { %v415_v52 = vmul.f32 %v394_v30, %v359_v45  ;;  %v344_v53 = vadd.f32 %v343_v49, %v245_v17  ;;  %v362_v56 = vmax.f32 %v352_v46, 0.0  ;;  %v431_v4 = vsel %vm419_vm2, %v417_v60, 0.0 }
 0x1bf   :  { %v424_v54 = vadd.f32 %v423_v50, %v422_v48 }
 0x1c0   :  { %v360_v57 = vmax.f32 %v344_v53, 0.0  ;;  %v427_v61 = vsel %vm419_vm2, %v415_v52, 0.0  ;;  %v418_v1 = vmul.f32 %v409_v63, %v362_v56 }
 0x1c1   :  { %v426_v59 = vadd.f32 %v425_v55, %v424_v54 }
 0x1c2   :  { %v416_v62 = vmul.f32 %v399_v47, %v360_v57  ;;  %v433_v6 = vsel %vm419_vm2, %v418_v1, 0.0 }
 0x1c3   :  { %v428_v0 = vadd.f32 %v427_v61, %v426_v59 }
 0x1c4   :  { %v429_v2 = vsel %vm419_vm2, %v416_v62, 0.0 }
 0x1c5   :  { %v430_v3 = vadd.f32 %v429_v2, %v428_v0 }
 0x1c7   :  { %v432_v5 = vadd.f32 %v431_v4, %v430_v3 }
 0x1c9   :  { %v434_v7 = vadd.f32 %v433_v6, %v432_v5 }
 0x1cb   :  { %v435_v8 = vrot.slane %v434_v7, 4 }
 0x1cd   :  { %v436_v9 = vadd.f32 %v435_v8, %v434_v7 }
 0x1cf   :  { %v437_v10 = vrot.slane %v436_v9, 2 }
 0x1d1   :  { %v438_v11 = vadd.f32 %v437_v10, %v436_v9 }
 0x1d3   :  { %v439_v12 = vrot.slane %v438_v11, 1 }
 0x1d5   :  { %v440_v14 = vadd.f32 %v439_v12, %v438_v11 }
 0x1d7   :  { %v443_v15 = vadd.f32 %v442_v13, %v440_v14 }
 0x1d9   :  { %v482_v16 = vmul.f32 -1.442695, %v443_v15 }
 0x1db   :  { %535 = vpow2.f32 %v482_v16 }
 0x1e8   :  { %v536_v17 = vpop.eup %535 }
 0x1e9   :  { %v447_v18 = vadd.f32 1.0, %v536_v17 }
 0x1eb   :  { %537 = vrcp.f32 %v447_v18 }
 0x1f8   :  { %v538_v19 = vpop.eup %537 }
 0x1f9   :  { %451 = vst.msk [vmem:[#allocation3] sm:$0x1] %vm450_vm3, %v538_v19 }
 0x1fa   :  { %550 = shalt.err (!%p547_p4)
}
 0x1fb   :  { %461 = dma.vmem_to_hbm [thread:$0]  %s459_s16, 16, %s736_s7, [#allocation4]  }
 0x1fc   :  { %559 = dma.done.wait [#allocation4], 16  }
 0x1fd   :  { %560 = vsyncadd [#allocation4], 4294967280 }
 0x1fe   :  { %465 = vsyncpa [#allocation4], 1 }

</bundles_post_ra>
